<compile_context>
chip_gen: v7x
topology: tpu7x:2x2x1
jax: 0.10.0
libtpu: 0.0.40
codegen_flags: <defaults>
</compile_context>

<pallas_src>
import math

import jax
import jax.numpy as jnp
from jax import lax
from jax.experimental import pallas as pl
from jax.experimental.pallas import tpu as pltpu


def _make_kernel(scale: float, has_mask: bool):
    def kernel(*refs):
        if has_mask:
            q_ref, k_ref, v_ref, m_ref, ctx_ref, attn_ref = refs
        else:
            q_ref, k_ref, v_ref, ctx_ref, attn_ref = refs
            m_ref = None

        # Fold the 1/sqrt(d_k) scale into Q (tq x D multiply, native dtype).
        q = q_ref[...] * jnp.asarray(scale, dtype=q_ref.dtype)   # (tq, D)
        k = k_ref[...]                                           # (S, D)
        v = v_ref[...]                                           # (S, D)

        # scores = Q @ K^T on the MXU, contracting last dims (no transpose),
        # f32 accumulate regardless of input dtype.
        scores = lax.dot_general(
            q, k,
            dimension_numbers=(((1,), (1,)), ((), ())),
            preferred_element_type=jnp.float32,
        )                                                        # (tq, S)

        # NOTE: exp() without max-subtraction, exactly matching torch.exp in
        # the reference. Overflows to +inf for |score| >~ 88 (f32), just like
        # the original module — kept for bit-faithful semantics.
        scores = jnp.exp(scores)
        if m_ref is not None:
            scores = scores * m_ref[...].astype(jnp.float32)

        denom = jnp.sum(scores, axis=-1, keepdims=True) + 1e-08
        # One reciprocal per row (EUP) + multiply instead of a (tq,S) divide.
        attn = scores * pl.reciprocal(denom, approx=False)

        ctx = jnp.dot(attn.astype(v.dtype), v,
                      preferred_element_type=jnp.float32)        # (tq, D)

        ctx_ref[...] = ctx.astype(ctx_ref.dtype)
        attn_ref[...] = attn.astype(attn_ref.dtype)

    return kernel


def _pick_tq(S: int, itemsize: int = 4) -> int:
    """Largest query tile (multiple of 8, divisor of S) whose (tq, S) slab
    stays within a small VMEM budget so double-buffering fits on every
    generation (v7x has only 64 MiB physical VMEM, 32 MiB default scoped)."""
    budget = 8 << 20
    for t in (256, 128, 64, 32, 16, 8):
        if S % t == 0 and t * S * itemsize <= budget:
            return t
    for t in (8, 16, 32, 64, 128, 256):
        if S % t == 0:
            return t
    return S  # ragged S: full-extent block (still legal per BlockSpec rules)


def scaled_dot_product_attention(Q, K, V, attn_mask=None):
    """Pallas implementation of ScaledDotProductAttention.forward.

    Q, K, V: [B, H, S, D]; attn_mask: [B, H, S, S] or None.
    Returns (context [B, H, S, D], attn [B, H, S, S]).
    """
    B, H, S, D = Q.shape
    BH = B * H
    tq = _pick_tq(S)
    scale = 1.0 / math.sqrt(D)

    q = Q.reshape(BH, S, D)
    k = K.reshape(BH, S, D)
    v = V.reshape(BH, S, D)

    # Squeezed leading (flattened batch*head) axis -> 2-D refs in the kernel.
    q_spec = pl.BlockSpec((None, tq, D), lambda i, j: (i, j, 0))
    kv_spec = pl.BlockSpec((None, S, D), lambda i, j: (i, 0, 0))
    ss_spec = pl.BlockSpec((None, tq, S), lambda i, j: (i, j, 0))

    has_mask = attn_mask is not None
    in_specs = [q_spec, kv_spec, kv_spec]
    operands = [q, k, v]
    if has_mask:
        in_specs.append(ss_spec)
        operands.append(attn_mask.reshape(BH, S, S))

    kernel = _make_kernel(scale, has_mask)

    ctx, attn = pl.pallas_call(
        kernel,
        out_shape=(
            jax.ShapeDtypeStruct((BH, S, D), Q.dtype),
            jax.ShapeDtypeStruct((BH, S, S), Q.dtype),
        ),
        grid_spec=pltpu.PrefetchScalarGridSpec(
            num_scalar_prefetch=0,
            grid=(BH, S // tq),
            in_specs=in_specs,
            out_specs=(q_spec, ss_spec),
        ),
        compiler_params=pltpu.CompilerParams(
            dimension_semantics=("parallel", "parallel"),
        ),
    )(*operands)

    return ctx.reshape(B, H, S, D), attn.reshape(B, H, S, S)


def _reference(Q, K, V, attn_mask=None):
    d_k = Q.shape[-1]
    scores = jnp.einsum("bhqd,bhkd->bhqk", Q, K) / jnp.sqrt(jnp.float32(d_k))
    scores = jnp.exp(scores)
    if attn_mask is not None:
        scores = scores * attn_mask
    attn = scores / (jnp.sum(scores, axis=-1, keepdims=True) + 1e-08)
    context = jnp.einsum("bhqk,bhkd->bhqd", attn, V)
    return context, attn


if __name__ == "__main__":
    key = jax.random.PRNGKey(0)
    B, H, S, D = 2, 2, 8, 32
    kq, kk, kv, km = jax.random.split(key, 4)
    Q = jax.random.normal(kq, (B, H, S, D), dtype=jnp.float32)
    K = jax.random.normal(kk, (B, H, S, D), dtype=jnp.float32)
    V = jax.random.normal(kv, (B, H, S, D), dtype=jnp.float32)
    attn_mask = (jax.random.uniform(km, (B, H, S, S)) > 0.2).astype(jnp.float32)

    # masked path
    ctx, attn = scaled_dot_product_attention(Q, K, V, attn_mask)
    jax.block_until_ready(ctx)
    jax.block_until_ready(attn)
    ctx_ref, attn_ref = _reference(Q, K, V, attn_mask)
    assert jnp.allclose(ctx, ctx_ref, atol=1e-4, rtol=1e-4)
    assert jnp.allclose(attn, attn_ref, atol=1e-4, rtol=1e-4)

    # maskless path (separate kernel variant, no ones-mask HBM traffic)
    ctx2, attn2 = scaled_dot_product_attention(Q, K, V, None)
    jax.block_until_ready(ctx2)
    ctx2_ref, attn2_ref = _reference(Q, K, V, None)
    assert jnp.allclose(ctx2, ctx2_ref, atol=1e-4, rtol=1e-4)
    assert jnp.allclose(attn2, attn2_ref, atol=1e-4, rtol=1e-4)

    print("KERNEL_OK")
</pallas_src>

<mosaic_0001>
module attributes {stable_mosaic.version = 11 : i64} {
  func.func @kernel(%arg0: i32, %arg1: i32, %arg2: memref<1x8x32xf32, #tpu.memory_space<vmem>>, %arg3: memref<1x8x32xf32, #tpu.memory_space<vmem>>, %arg4: memref<1x8x32xf32, #tpu.memory_space<vmem>>, %arg5: memref<1x8x8xf32, #tpu.memory_space<vmem>>, %arg6: memref<1x8x32xf32, #tpu.memory_space<vmem>>, %arg7: memref<1x8x8xf32, #tpu.memory_space<vmem>>) attributes {dimension_semantics = [#tpu.dimension_semantics<parallel>, #tpu.dimension_semantics<parallel>], iteration_bounds = array<i64: 4, 1>, scalar_prefetch = 0 : i64, scratch_operands = 0 : i64, tpu.core_type = #tpu.core_type<tc>, window_params = [{transform_indices = @transform_0, window_bounds = array<i64: 1, 8, 32>}, {transform_indices = @transform_1, window_bounds = array<i64: 1, 8, 32>}, {transform_indices = @transform_2, window_bounds = array<i64: 1, 8, 32>}, {transform_indices = @transform_3, window_bounds = array<i64: 1, 8, 8>}, {transform_indices = @transform_4, window_bounds = array<i64: 1, 8, 32>}, {transform_indices = @transform_5, window_bounds = array<i64: 1, 8, 8>}]} {
    %c0 = arith.constant 0 : index
    %c0_0 = arith.constant 0 : index
    %c0_1 = arith.constant 0 : index
    %0 = vector.load %arg2[%c0, %c0_0, %c0_1] : memref<1x8x32xf32, #tpu.memory_space<vmem>>, vector<1x8x32xf32>
    %1 = vector.shape_cast %0 : vector<1x8x32xf32> to vector<8x32xf32>
    %cst = arith.constant 0.176776692 : f32
    %2 = vector.broadcast %cst : f32 to vector<8x32xf32>
    %3 = arith.mulf %1, %2 : vector<8x32xf32>
    %c0_2 = arith.constant 0 : index
    %c0_3 = arith.constant 0 : index
    %c0_4 = arith.constant 0 : index
    %4 = vector.load %arg3[%c0_2, %c0_3, %c0_4] : memref<1x8x32xf32, #tpu.memory_space<vmem>>, vector<1x8x32xf32>
    %5 = vector.shape_cast %4 : vector<1x8x32xf32> to vector<8x32xf32>
    %c0_5 = arith.constant 0 : index
    %c0_6 = arith.constant 0 : index
    %c0_7 = arith.constant 0 : index
    %6 = vector.load %arg4[%c0_5, %c0_6, %c0_7] : memref<1x8x32xf32, #tpu.memory_space<vmem>>, vector<1x8x32xf32>
    %7 = vector.shape_cast %6 : vector<1x8x32xf32> to vector<8x32xf32>
    %cst_8 = arith.constant dense<0.000000e+00> : vector<8x8xf32>
    %8 = tpu.matmul %3, %5, %cst_8 {dimension_numbers = #tpu.dot_dimension_numbers<[1], [1], [0], [0], [0, 0, 1, 0], [], []>} : vector<8x32xf32>, vector<8x32xf32>, vector<8x8xf32> -> vector<8x8xf32>
    %9 = math.exp %8 : vector<8x8xf32>
    %c0_9 = arith.constant 0 : index
    %c0_10 = arith.constant 0 : index
    %c0_11 = arith.constant 0 : index
    %10 = vector.load %arg5[%c0_9, %c0_10, %c0_11] : memref<1x8x8xf32, #tpu.memory_space<vmem>>, vector<1x8x8xf32>
    %11 = vector.shape_cast %10 : vector<1x8x8xf32> to vector<8x8xf32>
    %12 = arith.mulf %9, %11 : vector<8x8xf32>
    %cst_12 = arith.constant dense<0.000000e+00> : vector<8xf32>
    %13 = vector.multi_reduction <add>, %12, %cst_12 [1] : vector<8x8xf32> to vector<8xf32>
    %14 = vector.shape_cast %13 : vector<8xf32> to vector<8x1xf32>
    %cst_13 = arith.constant 9.99999993E-9 : f32
    %15 = vector.broadcast %cst_13 : f32 to vector<8x1xf32>
    %16 = arith.addf %14, %15 : vector<8x1xf32>
    %17 = tpu.reciprocal %16 : vector<8x1xf32> -> vector<8x1xf32>
    %18 = vector.broadcast %17 : vector<8x1xf32> to vector<8x8xf32>
    %19 = arith.mulf %12, %18 : vector<8x8xf32>
    %cst_14 = arith.constant dense<0.000000e+00> : vector<8x32xf32>
    %20 = tpu.matmul %19, %7, %cst_14 {dimension_numbers = #tpu.dot_dimension_numbers<[1], [0], [0], [1], [0, 0, 1, 1], [], []>} : vector<8x8xf32>, vector<8x32xf32>, vector<8x32xf32> -> vector<8x32xf32>
    %c0_15 = arith.constant 0 : index
    %c0_16 = arith.constant 0 : index
    %c0_17 = arith.constant 0 : index
    %21 = vector.load %arg6[%c0_15, %c0_16, %c0_17] : memref<1x8x32xf32, #tpu.memory_space<vmem>>, vector<1x8x32xf32>
    %22 = vector.shape_cast %21 : vector<1x8x32xf32> to vector<8x32xf32>
    %23 = vector.shape_cast %20 : vector<8x32xf32> to vector<1x8x32xf32>
    tpu.vector_store %arg6[%c0_15, %c0_16, %c0_17], %23 {strides = array<i32>} : memref<1x8x32xf32, #tpu.memory_space<vmem>>, vector<1x8x32xf32>,
    %c0_18 = arith.constant 0 : index
    %c0_19 = arith.constant 0 : index
    %c0_20 = arith.constant 0 : index
    %24 = vector.load %arg7[%c0_18, %c0_19, %c0_20] : memref<1x8x8xf32, #tpu.memory_space<vmem>>, vector<1x8x8xf32>
    %25 = vector.shape_cast %24 : vector<1x8x8xf32> to vector<8x8xf32>
    %26 = vector.shape_cast %19 : vector<8x8xf32> to vector<1x8x8xf32>
    tpu.vector_store %arg7[%c0_18, %c0_19, %c0_20], %26 {strides = array<i32>} : memref<1x8x8xf32, #tpu.memory_space<vmem>>, vector<1x8x8xf32>,
    return
  }
  func.func @transform_0(%arg0: i32, %arg1: i32) -> (i32, i32, i32) {
    %c0_i32 = arith.constant 0 : i32
    %c0_i32_0 = arith.constant 0 : i32
    return %arg0, %arg1, %c0_i32 : i32, i32, i32
  }
  func.func @transform_1(%arg0: i32, %arg1: i32) -> (i32, i32, i32) {
    %c0_i32 = arith.constant 0 : i32
    %c0_i32_0 = arith.constant 0 : i32
    %c0_i32_1 = arith.constant 0 : i32
    return %arg0, %c0_i32, %c0_i32_0 : i32, i32, i32
  }
  func.func @transform_2(%arg0: i32, %arg1: i32) -> (i32, i32, i32) {
    %c0_i32 = arith.constant 0 : i32
    %c0_i32_0 = arith.constant 0 : i32
    %c0_i32_1 = arith.constant 0 : i32
    return %arg0, %c0_i32, %c0_i32_0 : i32, i32, i32
  }
  func.func @transform_3(%arg0: i32, %arg1: i32) -> (i32, i32, i32) {
    %c0_i32 = arith.constant 0 : i32
    %c0_i32_0 = arith.constant 0 : i32
    return %arg0, %arg1, %c0_i32 : i32, i32, i32
  }
  func.func @transform_4(%arg0: i32, %arg1: i32) -> (i32, i32, i32) {
    %c0_i32 = arith.constant 0 : i32
    %c0_i32_0 = arith.constant 0 : i32
    return %arg0, %arg1, %c0_i32 : i32, i32, i32
  }
  func.func @transform_5(%arg0: i32, %arg1: i32) -> (i32, i32, i32) {
    %c0_i32 = arith.constant 0 : i32
    %c0_i32_0 = arith.constant 0 : i32
    return %arg0, %arg1, %c0_i32 : i32, i32, i32
  }
}

</mosaic_0001>

<bundles_post_ra>
// kernel: tpu_custom_call.1
= control target key start
LH: loop header
LB: loop body
LE: loop exit
PB: predicated region body
PF: predicated region fallthrough
CT: control target
= control target key end

     0   :  { %s1498_s0 = inlined_call_operand.hbm [shape: f32[4,8,32], index: 0, kind: input, shape index: {}]   ;;  %s1499_s1 = inlined_call_operand.hbm [shape: f32[4,8,32], index: 1, kind: input, shape index: {}]   ;;  %s1500_s2 = inlined_call_operand.hbm [shape: f32[4,8,32], index: 2, kind: input, shape index: {}]   ;;  %s1501_s3 = inlined_call_operand.hbm [shape: f32[4,8,8], index: 3, kind: input, shape index: {}]   ;;  %s1502_s4 = inlined_call_operand.hbm [shape: f32[4,8,32], index: 4, kind: output, shape index: {0}]   ;;  %s1503_s5 = inlined_call_operand.hbm [shape: f32[4,8,8], index: 5, kind: output, shape index: {1}]  }
   0x1   :  { %1513 = sst [smem:[#allocation24_spill]] %s1499_s1 }
   0x2   :  { %11 = vsyncpa [#allocation3], 0 }
   0x3   :  { %13 = vsyncpa [#allocation3 + $0x1], 0 }
   0x4   :  { %14 = vsyncpa [#allocation6], 0 }
   0x5   :  { %16 = vsyncpa [#allocation6 + $0x1], 0 }
   0x6   :  { %17 = vsyncpa [#allocation9], 0 }
   0x7   :  { %19 = vsyncpa [#allocation9 + $0x1], 0 }
   0x8   :  { %20 = vsyncpa [#allocation4], 0 }
   0x9   :  { %22 = vsyncpa [#allocation4 + $0x1], 0 }
   0xa   :  { %23 = vsyncpa [#allocation12], 0 }
   0xb   :  { %25 = vsyncpa [#allocation12 + $0x1], 0  ;;  %s1174_s18 = smov 0   ;;  %s1176_s19 = smov 0  }
   0xc   :  { %s1178_s20 = smov 0   ;;  %s1180_s21 = smov 0  }
   0xd   :  { %s1182_s22 = smov 0   ;;  %s1184_s23 = smov 0  }
   0xe LB: > { %1514 = sst [smem:[#allocation18_spill]] %s1114_s18  ;;  %s1205_s24 = sadd.s32 4294967295, %s1134_s23   ;;  %s1134_s23 = sphi %s1184_s23, %s31_s23   ;;  %s1130_s22 = sphi %s1182_s22, %s1541_s22   ;;  %s1126_s21 = sphi %s1180_s21, %s1540_s21   ;;  %s1122_s20 = sphi %s1178_s20, %s1539_s20   ;;  %s1118_s19 = sphi %s1176_s19, %s1543_s19   ;;  %s1114_s18 = sphi %s1174_s18, %s1542_s18  }
   0xf   : > { %1515 = sst [smem:[#allocation19_spill]] %s1122_s20  ;;  %s763_s25 = sadd.s32 4294967294, %s1134_s23  }
  0x10   : > { %1516 = sst [smem:[#allocation20_spill]] %s1130_s22  ;;  %s43_s26 = sadd.s32 1, %s1130_s22 }
  0x11   : > { %s52_s27 = sadd.s32 1, %s1122_s20  ;;  %p45_p0 = scmp.ge.s32.totalorder %s43_s26, 4 }
  0x12   : > { %p59_p1 = scmp.ne.s32.totalorder %s1122_s20, %s1118_s19  ;;  %p60_p2 = scmp.eq.s32.totalorder %s1134_s23, 0 }
  0x13   : > { %p65_p3 = scmp.ne.s32.totalorder %s1118_s19, %s1114_s18  ;;  %s1545_s26 = smov (%p45_p0, %s43_s26), 0 }
  0x14   : > { %1517 = sst [smem:[#allocation21_spill]] %s1545_s26  ;;  %p1217_p4 = por %p60_p2, %p59_p1 }
  0x15   : > { %p66_p5 = scmp.eq.s32.totalorder %s1205_s24, 0  ;;  %s47_s29 = ssub.s32 %s1130_s22, %s1545_s26 }
  0x16   : > { %p171_p6 = scmp.eq.s32.totalorder %s1205_s24, 3  ;;  %p50_p7 = scmp.eq.s32.totalorder %s47_s29, 0 }
  0x17   : > { %p1225_p8 = por %p66_p5, %p65_p3  ;;  %p177_p10 = scmp.eq.s32.totalorder %s763_s25, 3 }
  0x18   : > { %p1229_p9 = por %p171_p6, %p59_p1  ;;  %p836_p12 = scmp.lt.s32.totalorder %s1134_s23, 4 }
  0x19   : > { %s1519_s30 = scalar_select %p1225_p8, 1, 0 }
  0x1a   : > { %s1520_s6 = scalar_select %p1229_p9, 1, 0 }
  0x1b   : > { %s1234_s7 = scalar_select %p50_p7, %s1122_s20, %s52_s27  }
  0x1c   : > { %p1236_p11 = por %p177_p10, %p65_p3  ;;  %s1242_s9 = sand.u32 1, %s1122_s20  }
  0x1d   : > { %1521 = sst [smem:[#allocation22_spill]] %s1234_s7  ;;  %s1245_s10 = sshll.u32 %s1242_s9, 3 }
  0x1e   : > { %s1522_s8 = scalar_select %p1236_p11, 1, 0 }
  0x1f   : > { %s1248_s11 = sshll.u32 %s1130_s22, 7  ;;  %p1252_p13 = pnand %p836_p12, %p1217_p4 }
  0x20   : > { %1523 = sst [smem:[#allocation23_spill]] %s1522_s8  ;;  %s244_s13 = sand.u32 1, %s1134_s23  }
  0x21   : > { %s1524_s12 = scalar_select %p1252_p13, 1, 0 }
  0x22   : > { %s1525_s1 = sld [smem:[#allocation24_spill]]  ;;  %s248_s17 = scalar_lea.vmem [#allocation5], %s1245_s10 }
  0x23   : > { %s255_s25 = sshll.u32 %s248_s17, 4  ;;  %s1268_s27 = scalar_lea.sflag [#allocation6], %s244_s13  ;;  %s1265_s25 = int_to_ptr.vmem [resolvable:$true] %s255_s25 }
  0x24   : > { %p1274_p3 = pneg %p1252_p13 }
  0x28   : > { %s1261_s16 = scalar_lea.hbm %s1525_s1, %s1248_s11  ;;  %s897_s17 = scalar_lea.hbm %s1525_s1, 512 }
  0x29   : > { %s892_s28 = scalar_lea.hbm %s1261_s16, 128  ;;  %p898_p6 = scmp.lt.u32.totalorder %s1261_s16, %s1525_s1 }
  0x2a   : > { %p893_p2 = scmp.ne.s32.totalorder %s1261_s16, %s892_s28  ;;  %p899_p7 = scmp.lt.u32.totalorder %s897_s17, %s892_s28 }
  0x2b   : > { %p901_p12 = scmp.lt.u32.totalorder %s892_s28, %s1261_s16 }
  0x2c   : > { %p895_p4 = pnand %p1274_p3, %p893_p2  ;;  %p900_p10 = por %p899_p7, %p898_p6 }
  0x2e   : > { %p896_p5 = pneg %p895_p4  ;;  %p902_p0 = por %p901_p12, %p900_p10 }
  0x30   : > { %p903_p1 = pnand %p902_p0, %p896_p5 }
  0x32   : > { %906 = shalt.err (!%p903_p1)
}
  0x33   : > { %s907_s13 = scalar_lea.vmem %s1265_s25, 128  ;;  %s1136_s14 = smov [#allocation5]  }
  0x34   : > { %p908_p2 = scmp.ne.s32.totalorder %s1265_s25, %s907_s13  ;;  %s912_s15 = sshll.u32 %s1136_s14, 4  ;;  %s913_s15 = int_to_ptr.vmem [resolvable:$false] %s912_s15 }
  0x35   : > { %s914_s22 = scalar_lea.vmem %s913_s15, 256  ;;  %p915_p9 = scmp.lt.s32.totalorder %s1265_s25, %s913_s15 }
  0x36   : > { %p910_p4 = pnand %p908_p2, %p1274_p3  ;;  %p916_p8 = scmp.lt.s32.totalorder %s914_s22, %s907_s13 }
  0x38   : > { %p911_p11 = pneg %p910_p4  ;;  %p917_p6 = por %p916_p8, %p915_p9 }
  0x3a   : > { %p918_p7 = pnand %p917_p6, %p911_p11 }
  0x3c   : > { %921 = shalt.err (!%p918_p7)
}
  0x3d   : > { %822 = dma.hbm_to_vmem [thread:$0]  (!%p1252_p13), %s1261_s16, 128, %s1265_s25, %s1268_s27  }
  0x3e   : > { %p1527_p0 = scmp.lt.s32.totalorder %s1134_s23, 5  ;;  %p1528_p1 = scmp.ge.s32.totalorder %s1134_s23, 1 }
  0x3f   : > { %s1310_s13 = scalar_lea.hbm %s1498_s0, %s1248_s11  ;;  %s229_s14 = scalar_lea.vmem [#allocation2], %s1245_s10 }
  0x40   : > { %p1302_p5 = pnand %p1528_p1, %p1527_p0  ;;  %s237_s15 = sshll.u32 %s229_s14, 4  ;;  %s1313_s15 = int_to_ptr.vmem [resolvable:$true] %s237_s15 }
  0x41   : > { %s1319_s22 = scalar_lea.hbm %s1500_s2, %s1248_s11  ;;  %s226_s1 = scalar_lea.sflag [#allocation3], %s1242_s9 }
  0x42   : > { %s1529_s26 = scalar_select %p1302_p5, 1, 0 }
  0x43   : > { %s922_s7 = scalar_lea.hbm %s1310_s13, 128  ;;  %s927_s20 = scalar_lea.hbm %s1498_s0, 512 }
  0x44   : > { %p923_p8 = scmp.ne.s32.totalorder %s1310_s13, %s922_s7  ;;  %p928_p10 = scmp.lt.u32.totalorder %s1310_s13, %s1498_s0 }
  0x45   : > { %p929_p12 = scmp.lt.u32.totalorder %s927_s20, %s922_s7  ;;  %p931_p4 = scmp.lt.u32.totalorder %s922_s7, %s1310_s13 }
  0x46   : > { %p925_p9 = pnand %p923_p8, %p1274_p3 }
  0x47   : > { %p930_p2 = por %p929_p12, %p928_p10 }
  0x48   : > { %p926_p11 = pneg %p925_p9 }
  0x49   : > { %p932_p6 = por %p931_p4, %p930_p2 }
  0x4b   : > { %p933_p7 = pnand %p932_p6, %p926_p11 }
  0x4d   : > { %936 = shalt.err (!%p933_p7)
}
  0x4e   : > { %s937_s14 = scalar_lea.vmem %s1313_s15, 128  ;;  %s1137_s16 = smov [#allocation2]  }
  0x4f   : > { %p938_p0 = scmp.ne.s32.totalorder %s1313_s15, %s937_s14  ;;  %s942_s25 = sshll.u32 %s1137_s16, 4  ;;  %s943_s25 = int_to_ptr.vmem [resolvable:$false] %s942_s25 }
  0x50   : > { %s944_s18 = scalar_lea.vmem %s943_s25, 256  ;;  %p945_p9 = scmp.lt.s32.totalorder %s1313_s15, %s943_s25 }
  0x51   : > { %p940_p1 = pnand %p938_p0, %p1274_p3  ;;  %p946_p5 = scmp.lt.s32.totalorder %s944_s18, %s937_s14 }
  0x53   : > { %p941_p8 = pneg %p940_p1  ;;  %p947_p10 = por %p946_p5, %p945_p9 }
  0x55   : > { %p948_p12 = pnand %p947_p10, %p941_p8 }
  0x57   : > { %951 = shalt.err (!%p948_p12)
}
  0x58   : > { %819 = dma.hbm_to_vmem [thread:$0]  (!%p1252_p13), %s1310_s13, 128, %s1313_s15, %s226_s1  }
  0x59   : > { %s266_s20 = scalar_lea.vmem [#allocation7], %s1245_s10  ;;  %s952_s8 = scalar_lea.hbm %s1319_s22, 128 }
  0x5a   : > { %s273_s7 = sshll.u32 %s266_s20, 4  ;;  %p953_p11 = scmp.ne.s32.totalorder %s1319_s22, %s952_s8  ;;  %s274_s7 = int_to_ptr.vmem [resolvable:$true] %s273_s7 }
  0x5b   : > { %s957_s14 = scalar_lea.hbm %s1500_s2, 512  ;;  %p958_p4 = scmp.lt.u32.totalorder %s1319_s22, %s1500_s2 }
  0x5c   : > { %p955_p5 = pnand %p953_p11, %p1274_p3  ;;  %p959_p6 = scmp.lt.u32.totalorder %s957_s14, %s952_s8 }
  0x5d   : > { %p961_p0 = scmp.lt.u32.totalorder %s952_s8, %s1319_s22 }
  0x5e   : > { %p956_p2 = pneg %p955_p5  ;;  %p960_p7 = por %p959_p6, %p958_p4 }
  0x60   : > { %p962_p1 = por %p961_p0, %p960_p7 }
  0x62   : > { %p963_p8 = pnand %p962_p1, %p956_p2 }
  0x64   : > { %966 = shalt.err (!%p963_p8)
}
  0x65   : > { %s967_s1 = scalar_lea.vmem %s274_s7, 128  ;;  %s1138_s13 = smov [#allocation7]  }
  0x66   : > { %p968_p9 = scmp.ne.s32.totalorder %s274_s7, %s967_s1  ;;  %s972_s15 = sshll.u32 %s1138_s13, 4  ;;  %s973_s15 = int_to_ptr.vmem [resolvable:$false] %s972_s15 }
  0x67   : > { %s974_s18 = scalar_lea.vmem %s973_s15, 256  ;;  %p975_p11 = scmp.lt.s32.totalorder %s274_s7, %s973_s15 }
  0x68   : > { %p970_p10 = pnand %p968_p9, %p1274_p3  ;;  %p976_p5 = scmp.lt.s32.totalorder %s974_s18, %s967_s1 }
  0x6a   : > { %p971_p12 = pneg %p970_p10  ;;  %p977_p13 = por %p976_p5, %p975_p11 }
  0x6c   : > { %p978_p4 = pnand %p977_p13, %p971_p12 }
  0x6e   : > { %981 = shalt.err (!%p978_p4)
}
  0x6f   : > { %p1530_p6 = scmp.ne.s32.totalorder %s1524_s12, 0  ;;  %s1366_s28 = scalar_lea.hbm %s1501_s3, %s1248_s11 }
  0x70   : > { %s284_s17 = scalar_lea.vmem [#allocation8], %s1245_s10  ;;  %s281_s16 = scalar_lea.sflag [#allocation9], %s1242_s9 }
  0x71   : > { %825 = dma.hbm_to_vmem [thread:$0]  (!%p1530_p6), %s1319_s22, 128, %s274_s7, %s1268_s27  }
  0x72   : > { %s292_s14 = sshll.u32 %s284_s17, 4  ;;  %s982_s25 = scalar_lea.hbm %s1366_s28, 128  ;;  %s293_s14 = int_to_ptr.vmem [resolvable:$true] %s292_s14 }
  0x73   : > { %p983_p13 = scmp.ne.s32.totalorder %s1366_s28, %s982_s25  ;;  %s987_s22 = scalar_lea.hbm %s1501_s3, 512 }
  0x74   : > { %p988_p0 = scmp.lt.u32.totalorder %s1366_s28, %s1501_s3  ;;  %p989_p1 = scmp.lt.u32.totalorder %s987_s22, %s982_s25 }
  0x75   : > { %p985_p2 = pnand %p983_p13, %p1274_p3  ;;  %p991_p9 = scmp.lt.u32.totalorder %s982_s25, %s1366_s28 }
  0x76   : > { %p990_p8 = por %p989_p1, %p988_p0 }
  0x77   : > { %p986_p7 = pneg %p985_p2 }
  0x78   : > { %p992_p10 = por %p991_p9, %p990_p8 }
  0x7a   : > { %p993_p12 = pnand %p992_p10, %p986_p7 }
  0x7c   : > { %996 = shalt.err (!%p993_p12)
}
  0x7d   : > { %s997_s9 = scalar_lea.vmem %s293_s14, 128  ;;  %s1139_s10 = smov [#allocation8]  }
  0x7e   : > { %p998_p11 = scmp.ne.s32.totalorder %s293_s14, %s997_s9  ;;  %s1002_s13 = sshll.u32 %s1139_s10, 4  ;;  %s1003_s13 = int_to_ptr.vmem [resolvable:$false] %s1002_s13 }
  0x7f   : > { %s1004_s15 = scalar_lea.vmem %s1003_s13, 256  ;;  %p1005_p13 = scmp.lt.s32.totalorder %s293_s14, %s1003_s13 }
  0x80   : > { %p1000_p5 = pnand %p998_p11, %p1274_p3  ;;  %p1006_p2 = scmp.lt.s32.totalorder %s1004_s15, %s997_s9 }
  0x82   : > { %p1001_p4 = pneg %p1000_p5  ;;  %p1007_p6 = por %p1006_p2, %p1005_p13 }
  0x84   : > { %p1008_p0 = pnand %p1007_p6, %p1001_p4 }
  0x86   : > { %1011 = shalt.err (!%p1008_p0)
}
  0x87   : > { %p1531_p1 = scmp.ne.s32.totalorder %s1524_s12, 0  ;;  %p1532_p7 = scmp.ne.s32.totalorder %s1529_s26, 0 }
  0x88   : > { %s1390_s29 = sand.u32 (!%p1532_p7), 1, %s1118_s19   ;;  %p1533_p3 = scmp.ne.s32.totalorder (!%p1532_p7), %s1519_s30, 0 }
  0x89   : > { %828 = dma.hbm_to_vmem [thread:$0]  (!%p1531_p1), %s1366_s28, 128, %s293_s14, %s281_s16  }
  0x8a   : > { %301 = sbr.rel (%p1532_p7) target bundleno = 769 (0x301), region = 36  ;;  %s1393_s18 = sshll.u32 (!%p1532_p7), %s1390_s29, 3 }
  0x8b   : > { %s304_s20 = scalar_lea.sflag (!%p1532_p7), [#allocation3], %s1390_s29  ;;  %s307_s8 = scalar_lea.vmem (!%p1532_p7), [#allocation2], %s1393_s18 }
  0x91   : > { %1093 = dma.done.wait (%p1533_p3), %s304_s20, 128  }
  0x92   : > { %1095 = vsyncadd (%p1533_p3), %s304_s20, 4294967168  ;;  %s312_s12 = sand.u32 1, %s1205_s24   ;;  %s316_s28 = scalar_lea.vmem [#allocation5], %s1393_s18 }
  0x93   : > { %s313_s26 = scalar_lea.sflag [#allocation6], %s312_s12 }
  0x94   : > { %1097 = dma.done.wait (%p1533_p3), %s313_s26, 256  }
  0x95   : > { %1099 = vsyncadd (%p1533_p3), %s313_s26, 4294967040  ;;  %s325_s17 = scalar_lea.vmem [#allocation7], %s1393_s18  ;;  %s331_s14 = scalar_lea.sflag [#allocation9], %s1390_s29 }
  0x96   : > { %s334_s16 = scalar_lea.vmem [#allocation8], %s1393_s18 }
  0x97   : > { %1101 = dma.done.wait (%p1533_p3), %s331_s14, 128  }
  0x98   : > { %1103 = vsyncadd (%p1533_p3), %s331_s14, 4294967168  ;;  %v1140_v0 = vmov 0.0   ;;  %vm1141_vm0 = vmmov 0   ;;  %vm385_vm1 = vcmask 261120   ;;  %v383_v1 = vld [vmem:[%s316_s28] sm:$0xff]  ;;  %v381_v2 = vld [vmem:[%s307_s8] sm:$0xff] }
  0x99   : > { %794 = vmatprep.subr.mxu0 %v1140_v0  ;;  %796 = vmatprep.mubr.msk.f32.mxu0 %vm1141_vm0, %v1140_v0  ;;  %v382_v3 = vmul.f32 0.17677669, %v381_v2  ;;  %v464_v7 = vld [vmem:[%s334_s16] sm:$0xff]  ;;  %vm466_vm2 = vcmask 64512   ;;  %v384_v11 = vld [vmem:[%s325_s17] sm:$0xff]  ;;  %s380_s24 = scalar_lea.vmem [#allocation11], %s1393_s18 }
  0x9a   : > { %799 = vmatprep.subr.mxu1 %v1140_v0  ;;  %801 = vmatprep.mubr.msk.f32.mxu1 %vm1141_vm0, %v1140_v0  ;;  %s786_s30 = sshll.u32 %s1126_s21, 7  ;;  %s582_s22 = sshll.u32 %s380_s24, 4  ;;  %s583_s22 = int_to_ptr.vmem [resolvable:$true] %s582_s22 }
  0x9b   : > { %795 = vmatpush3.xpose.msk.msra.mxu0 %vm385_vm1, %v383_v1  ;;  %800 = vmatpush3.msra.mxu1 %v384_v11  ;;  %s1423_s27 = scalar_lea.hbm %s1503_s5, %s786_s30  ;;  %s554_s7 = scalar_lea.sflag [#allocation12], %s1390_s29 }
  0x9c   : > { %s1012_s11 = scalar_lea.vmem %s583_s22, 128  ;;  %p1534_p8 = scmp.ne.s32.totalorder %s1520_s6, 0 }
  0x9d   : > { %p1013_p6 = scmp.ne.s32.totalorder %s583_s22, %s1012_s11  ;;  %s1142_s9 = smov [#allocation11]  }
  0x9e   : > { %797 = vmatmul.mubr.msk.f32.vlgmr.msra.gmra.mrb[0].mxu0 %vm385_vm1, %v382_v3  ;;  %s1016_s10 = sshll.u32 %s1142_s9, 4  ;;  %s1017_s10 = int_to_ptr.vmem [resolvable:$false] %s1016_s10 }
  0x9f   : > { %p1014_p9 = pnand %p1013_p6, %p1534_p8  ;;  %s1018_s13 = scalar_lea.vmem %s1017_s10, 256 }
  0xa0   : > { %p1019_p12 = scmp.lt.s32.totalorder %s583_s22, %s1017_s10  ;;  %p1020_p11 = scmp.lt.s32.totalorder %s1018_s13, %s1012_s11 }
  0xa1   : > { %p1015_p10 = pneg %p1014_p9 }
  0xa2   : > { %p1021_p5 = por %p1020_p11, %p1019_p12 }
  0xa4   : > { %p1022_p4 = pnand %p1021_p5, %p1015_p10 }
 0x171   : > { %v458_v4 = vpop.f32.mrb[0].mxu0 }
 0x172   : > { %v462_v5 = vmul.f32 1.442695, %v458_v4  ;;  %v798_v6 = vpop.f32.mrb[1].mxu0 }
 0x174   : > { %888 = vpow2.f32 %v462_v5 }
 0x17e   : > { %v889_v8 = vpop.eup %888 }
 0x17f   : > { %v465_v9 = vmul.f32 %v889_v8, %v464_v7 }
 0x181   : > { %v467_v10 = vsel %vm466_vm2, %v465_v9, 0.0 }
 0x182   : > { %468 = vadd.xlane.f32.xlu0 %v467_v10 }
 0x20f   : > { %v469_v12 = vpop.xlane.xlu0 %468 }
 0x210   : > { %v470_v13 = vadd.f32 1e-08, %v469_v12 }
 0x212   : > { %890 = vrcp.f32 %v470_v13 }
 0x21c   : > { %v891_v14 = vpop.eup %890 }
 0x21d   : > { %v472_v15 = vmul.f32 %v891_v14, %v465_v9 }
 0x21f   : > { %802 = vmatmul.mubr.msk.f32.vlgmr.msra.gmra.mrb[0].mxu1 %vm466_vm2, %v472_v15  ;;  %547 = vst.msk [vmem:[%s380_s24] sm:$0xff] %vm466_vm2, %v472_v15 }
 0x220   : > { %1025 = shalt.err (!%p1022_p4)
}
 0x221   : > { %s1026_s15 = scalar_lea.hbm %s1423_s27, 128  ;;  %s1030_s12 = scalar_lea.hbm %s1503_s5, 512 }
 0x222   : > { %p1027_p13 = scmp.ne.s32.totalorder %s1423_s27, %s1026_s15  ;;  %p1031_p1 = scmp.lt.u32.totalorder %s1423_s27, %s1503_s5 }
 0x223   : > { %p1032_p7 = scmp.lt.u32.totalorder %s1030_s12, %s1026_s15  ;;  %p1034_p6 = scmp.lt.u32.totalorder %s1026_s15, %s1423_s27 }
 0x224   : > { %p1028_p2 = pnand %p1027_p13, %p1534_p8 }
 0x225   : > { %p1033_p3 = por %p1032_p7, %p1031_p1 }
 0x226   : > { %p1029_p0 = pneg %p1028_p2 }
 0x227   : > { %p1035_p9 = por %p1034_p6, %p1033_p3 }
 0x229   : > { %p1036_p10 = pnand %p1035_p9, %p1029_p0 }
 0x22b   : > { %1039 = shalt.err (!%p1036_p10)
}
 0x22c   : > { %813 = dma.vmem_to_hbm [thread:$0]  (%p1534_p8), %s583_s22, 128, %s1423_s27, %s554_s7  }
 0x22d   : > { %s373_s17 = scalar_lea.vmem [#allocation10], %s1393_s18  ;;  %s1449_s25 = scalar_lea.hbm %s1502_s4, %s786_s30 }
 0x22e   : > { %s568_s14 = sshll.u32 %s373_s17, 4  ;;  %s549_s1 = scalar_lea.sflag [#allocation4], %s1390_s29  ;;  %s1451_s14 = int_to_ptr.vmem [resolvable:$true] %s568_s14 }
 0x22f   : > { %s1040_s11 = scalar_lea.vmem %s1451_s14, 128  ;;  %s1143_s21 = smov [#allocation10]  }
 0x230   : > { %p1041_p12 = scmp.ne.s32.totalorder %s1451_s14, %s1040_s11  ;;  %s1044_s18 = sshll.u32 %s1143_s21, 4  ;;  %s1045_s18 = int_to_ptr.vmem [resolvable:$false] %s1044_s18 }
 0x231   : > { %s1046_s30 = scalar_lea.vmem %s1045_s18, 256  ;;  %p1047_p4 = scmp.lt.s32.totalorder %s1451_s14, %s1045_s18 }
 0x232   : > { %p1042_p11 = pnand %p1041_p12, %p1534_p8  ;;  %p1048_p13 = scmp.lt.s32.totalorder %s1046_s30, %s1040_s11 }
 0x234   : > { %p1043_p5 = pneg %p1042_p11  ;;  %p1049_p2 = por %p1048_p13, %p1047_p4 }
 0x236   : > { %p1050_p0 = pnand %p1049_p2, %p1043_p5 }
 0x2f2   : > { %v542_v16 = vpop.f32.mrb[0].mxu1 }
 0x2f3   : > { %546 = vst.msk [vmem:[%s373_s17] sm:$0xff] %vm385_vm1, %v542_v16  ;;  %v803_v17 = vpop.f32.mrb[1].mxu1 }
 0x2f4   : > { %1053 = shalt.err (!%p1050_p0)
}
 0x2f5   : > { %s1054_s29 = scalar_lea.hbm %s1449_s25, 128  ;;  %s1058_s7 = scalar_lea.hbm %s1502_s4, 512 }
 0x2f6   : > { %p1055_p1 = scmp.ne.s32.totalorder %s1449_s25, %s1054_s29  ;;  %p1059_p6 = scmp.lt.u32.totalorder %s1449_s25, %s1502_s4 }
 0x2f7   : > { %p1060_p9 = scmp.lt.u32.totalorder %s1058_s7, %s1054_s29  ;;  %p1062_p12 = scmp.lt.u32.totalorder %s1054_s29, %s1449_s25 }
 0x2f8   : > { %p1056_p7 = pnand %p1055_p1, %p1534_p8 }
 0x2f9   : > { %p1061_p10 = por %p1060_p9, %p1059_p6 }
 0x2fa   : > { %p1057_p3 = pneg %p1056_p7 }
 0x2fb   : > { %p1063_p11 = por %p1062_p12, %p1061_p10 }
 0x2fd   : > { %p1064_p5 = pnand %p1063_p11, %p1057_p3 }
 0x2ff   : > { %1067 = shalt.err (!%p1064_p5)
}
 0x300   : > { %812 = dma.vmem_to_hbm [thread:$0]  (%p1534_p8), %s1451_s14, 128, %s1449_s25, %s549_s1  }
 0x301 PF: > { %s1535_s13 = sld [smem:[#allocation18_spill]]  ;;  %s1536_s15 = sld [smem:[#allocation23_spill]] }
 0x302   : > { %p837_p4 = scmp.ge.s32.totalorder %s1134_s23, 2 }
 0x307   : > { %s594_s20 = sand.u32 1, %s1535_s13   ;;  %p1537_p13 = scmp.ne.s32.totalorder %s1536_s15, 0 }
 0x308   : > { %s595_s8 = scalar_lea.sflag [#allocation4], %s594_s20 }
 0x309   : > { %p830_p2 = pnand %p837_p4, %p1537_p13 }
 0x30b   : > { %1105 = dma.done.wait (!%p830_p2), %s595_s8, 128  }
 0x30c   : > { %1107 = vsyncadd (!%p830_p2), %s595_s8, 4294967168  ;;  %s604_s12 = scalar_lea.sflag [#allocation12], %s594_s20 }
 0x30d   : > { %1109 = dma.done.wait (!%p830_p2), %s604_s12, 128  }
 0x30e   : > { %1111 = vsyncadd (!%p830_p2), %s604_s12, 4294967168  ;;  %s31_s23 = sadd.s32 1, %s1134_s23   ;;  %s1538_s6 = sld [smem:[#allocation19_spill]] }
 0x30f   : > { %p28_p0 = scmp.ge.s32.totalorder %s31_s23, 6   ;;  %s1539_s20 = sld [smem:[#allocation22_spill]] }
 0x310   : > { %s1540_s21 = sld [smem:[#allocation20_spill]]  ;;  %s1541_s22 = sld [smem:[#allocation21_spill]] }
 0x311   : > { %s1542_s18 = smov %s1118_s19  ;;  %30 = sbr.rel (!%p28_p0) target bundleno = 14 (0xe), region = 135 }
 0x314   : > { %s1543_s19 = smov %s1538_s6 }
 0x318   :  { %609 = vsyncpa [#allocation3], 1 }
 0x319   :  { %611 = vsyncpa [#allocation3 + $0x1], 1 }
 0x31a   :  { %612 = vsyncpa [#allocation6], 1 }
 0x31b   :  { %614 = vsyncpa [#allocation6 + $0x1], 1 }
 0x31c   :  { %615 = vsyncpa [#allocation9], 1 }
 0x31d   :  { %617 = vsyncpa [#allocation9 + $0x1], 1 }
 0x31e   :  { %618 = vsyncpa [#allocation4], 1 }
 0x31f   :  { %620 = vsyncpa [#allocation4 + $0x1], 1 }
 0x320   :  { %621 = vsyncpa [#allocation12], 1 }
 0x321   :  { %623 = vsyncpa [#allocation12 + $0x1], 1 }

</bundles_post_ra>
